<compile_context>
chip_gen: v6e
topology: v6e:2x2x1
jax: 0.10.0
libtpu: 0.0.40
codegen_flags: <defaults>
</compile_context>

<pallas_src>
import functools

import jax
import jax.numpy as jnp
from jax import lax
from jax.experimental import pallas as pl
from jax.experimental.pallas import tpu as pltpu


def _mlloss_kernel(w_ref, x_ref, out_ref, *, n_valid, block_k):
    """One grid step: reduce `block_k` flattened matrices against the fused weights.

    w_ref  : (1, P)        fused weight row (precomputed in the wrapper)
    x_ref  : (block_k, P)  block_k flattened (lane-padded) similarity matrices
    out_ref: (8, 128)      per-block partial loss (broadcast scalar, lane-dense)
    """
    n = pl.program_id(0)

    x = x_ref[...].astype(jnp.float32)              # (block_k, P)
    w = w_ref[...]                                  # (1, P), broadcasts over rows

    # Fused masked reduction: one multiply + one per-row lane reduce (XLU).
    s = jnp.sum(x * w, axis=1, keepdims=True)       # (block_k, 1)

    # Per-matrix hinge (ReLU must stay per matrix).
    partial = jnp.maximum(1.0 + s, 0.0)             # (block_k, 1)

    # Mask out zero-padded rows (global matrix index >= N); padded rows would
    # otherwise contribute max(1 + 0, 0) = 1 each.
    row_ids = n * block_k + lax.broadcasted_iota(jnp.int32, (block_k, 1), 0)
    partial = jnp.where(row_ids < n_valid, partial, 0.0)

    block_sum = jnp.sum(partial, keepdims=True)     # (1, 1)
    out_ref[...] = jnp.broadcast_to(block_sum, (8, 128)).astype(jnp.float32)


def ml_loss(inputs, target, eps=1e-6, block_bytes=2 << 20):
    """inputs: (N, B, B) array (or list of (B, B) arrays); target: (B,) binary labels."""
    if isinstance(inputs, (list, tuple)):
        x = jnp.stack([jnp.asarray(m) for m in inputs], axis=0)
    else:
        x = jnp.asarray(inputs)
    N, B, _ = x.shape

    # ---- One-time mask / denominator / weight construction (depends only on target).
    t = jnp.asarray(target)
    tb = t != 0
    diff_mat = jnp.logical_xor(tb[:, None], tb[None, :]).astype(jnp.float32)
    or_mat = jnp.logical_or(jnp.logical_or(tb[:, None], tb[None, :]),
                            jnp.eye(B, dtype=bool))
    sim_mat = 1.0 - or_mat.astype(jnp.float32)
    w = (diff_mat / (jnp.sum(diff_mat) + eps)
         - sim_mat / (jnp.sum(sim_mat) + eps))      # (B, B) fused weights, f32

    # ---- Lane-dense flatten: (N, B*B) padded to a multiple of 128 lanes.
    bb = B * B
    P = 128 * pl.cdiv(bb, 128)
    x2 = x.reshape(N, bb)
    w2 = w.reshape(1, bb)
    if P != bb:
        x2 = jnp.pad(x2, ((0, 0), (0, P - bb)))
        w2 = jnp.pad(w2, ((0, 0), (0, P - bb)))

    # ---- block_k matrices per grid step (~block_bytes per input block, multiple of 8 rows,
    #      capped at the 8-padded N so we never allocate more VMEM than needed).
    itemsize = jnp.dtype(x2.dtype).itemsize
    block_k = max(8, (int(block_bytes) // (P * itemsize)) // 8 * 8)
    block_k = min(block_k, pl.cdiv(N, 8) * 8)
    grid = pl.cdiv(N, block_k)
    n_pad = grid * block_k
    if n_pad != N:
        x2 = jnp.pad(x2, ((0, n_pad - N), (0, 0)))

    out = pl.pallas_call(
        functools.partial(_mlloss_kernel, n_valid=N, block_k=block_k),
        out_shape=jax.ShapeDtypeStruct((8 * grid, 128), jnp.float32),
        grid=(grid,),
        in_specs=[
            pl.BlockSpec((1, P), lambda n: (0, 0)),          # fused weight row (resident)
            pl.BlockSpec((block_k, P), lambda n: (n, 0)),    # block_k matrices / step
        ],
        out_specs=pl.BlockSpec((8, 128), lambda n: (n, 0)),  # per-block partial loss
        compiler_params=pltpu.CompilerParams(
            dimension_semantics=("parallel",)),               # independent blocks (megacore)
    )(w2, x2)

    # Final tiny reduction of per-block partials in XLA (grid scalars).
    return jnp.sum(out.reshape(grid, 8, 128)[:, 0, 0])


def ml_loss_ref(inputs, target, eps=1e-6):
    """Pure-JAX reference mirroring the PyTorch forward."""
    x = jnp.asarray(inputs)
    B = target.shape[0]
    tb = jnp.asarray(target) != 0
    mat_1 = jnp.tile(tb[:, None], (1, B))
    mat_2 = jnp.tile(tb[None, :], (B, 1))
    diff_mat = jnp.logical_xor(mat_1, mat_2).astype(jnp.float32)
    or_mat = jnp.logical_or(jnp.logical_or(mat_1, mat_2), jnp.eye(B, dtype=bool))
    sim_mat = 1.0 - or_mat.astype(jnp.float32)
    loss = jnp.float32(0.0)
    for m in x:
        diff = jnp.sum(m * diff_mat) / (jnp.sum(diff_mat) + eps)
        sim = jnp.sum(m * sim_mat) / (jnp.sum(sim_mat) + eps)
        partial = 1.0 - sim + diff
        loss = loss + jnp.maximum(partial, 0.0)
    return loss


if __name__ == "__main__":
    key = jax.random.PRNGKey(0)
    B = 8   # batch size
    N = 3   # number of similarity matrices in `input`

    k1, k2, k3 = jax.random.split(key, 3)
    target = (jax.random.uniform(k1, (B,)) > 0.5).astype(jnp.float32)
    mats = jax.random.uniform(k2, (N, B, B), dtype=jnp.float32)

    loss = ml_loss(mats, target)
    jax.block_until_ready(loss)
    ref = ml_loss_ref(mats, target)
    assert jnp.allclose(loss, ref, atol=1e-5), (loss, ref)

    # Second check: multiple grid steps + row padding/masking path.
    N2 = 37
    mats2 = jax.random.uniform(k3, (N2, B, B), dtype=jnp.float32)
    loss2 = ml_loss(mats2, target, block_bytes=8 * 128 * 4)  # force block_k=8, grid=5
    jax.block_until_ready(loss2)
    ref2 = ml_loss_ref(mats2, target)
    assert jnp.allclose(loss2, ref2, atol=1e-4), (loss2, ref2)

    print("KERNEL_OK")
</pallas_src>

<mosaic_0001>
module attributes {stable_mosaic.version = 11 : i64} {
  func.func @_mlloss_kernel(%arg0: i32, %arg1: memref<1x128xf32, #tpu.memory_space<vmem>>, %arg2: memref<8x128xf32, #tpu.memory_space<vmem>>, %arg3: memref<8x128xf32, #tpu.memory_space<vmem>>) attributes {dimension_semantics = [#tpu.dimension_semantics<parallel>], iteration_bounds = array<i64: 1>, scalar_prefetch = 0 : i64, scratch_operands = 0 : i64, tpu.core_type = #tpu.core_type<tc>, window_params = [{pipeline_mode = #tpu.pipeline_mode<synchronous>, transform_indices = @transform_0, window_bounds = array<i64: 1, 128>}, {transform_indices = @transform_1, window_bounds = array<i64: 8, 128>}, {transform_indices = @transform_2, window_bounds = array<i64: 8, 128>}]} {
    %c0 = arith.constant 0 : index
    %c0_0 = arith.constant 0 : index
    %0 = vector.load %arg2[%c0, %c0_0] : memref<8x128xf32, #tpu.memory_space<vmem>>, vector<8x128xf32>
    %c0_1 = arith.constant 0 : index
    %c0_2 = arith.constant 0 : index
    %1 = vector.load %arg1[%c0_1, %c0_2] : memref<1x128xf32, #tpu.memory_space<vmem>>, vector<1x128xf32>
    %2 = vector.broadcast %1 : vector<1x128xf32> to vector<8x128xf32>
    %3 = arith.mulf %0, %2 : vector<8x128xf32>
    %cst = arith.constant dense<0.000000e+00> : vector<8xf32>
    %4 = vector.multi_reduction <add>, %3, %cst [1] : vector<8x128xf32> to vector<8xf32>
    %5 = vector.shape_cast %4 : vector<8xf32> to vector<8x1xf32>
    %cst_3 = arith.constant 1.000000e+00 : f32
    %6 = vector.broadcast %cst_3 : f32 to vector<8x1xf32>
    %7 = arith.addf %6, %5 : vector<8x1xf32>
    %cst_4 = arith.constant 0.000000e+00 : f32
    %8 = vector.broadcast %cst_4 : f32 to vector<8x1xf32>
    %9 = arith.maximumf %7, %8 : vector<8x1xf32>
    %c8_i32 = arith.constant 8 : i32
    %10 = arith.muli %arg0, %c8_i32 : i32
    %11 = tpu.iota {dimensions = array<i32: 0>} : vector<8x1xi32>
    %12 = vector.broadcast %10 : i32 to vector<8x1xi32>
    %13 = arith.addi %12, %11 : vector<8x1xi32>
    %c3_i32 = arith.constant 3 : i32
    %14 = vector.broadcast %c3_i32 : i32 to vector<8x1xi32>
    %15 = arith.cmpi slt, %13, %14 : vector<8x1xi32>
    %cst_5 = arith.constant 0.000000e+00 : f32
    %16 = vector.broadcast %cst_5 : f32 to vector<8x1xf32>
    %17 = arith.select %15, %9, %16 : vector<8x1xi1>, vector<8x1xf32>
    %18 = vector.shape_cast %17 : vector<8x1xf32> to vector<1x8x1xf32>
    %cst_6 = arith.constant dense<0.000000e+00> : vector<1xf32>
    %19 = vector.multi_reduction <add>, %18, %cst_6 [1, 2] : vector<1x8x1xf32> to vector<1xf32>
    %20 = vector.shape_cast %19 : vector<1xf32> to vector<1x1x1xf32>
    %21 = vector.extract %20[0, 0, 0] : f32 from vector<1x1x1xf32>
    %22 = vector.broadcast %21 : f32 to vector<1x1xf32>
    %23 = vector.shape_cast %22 : vector<1x1xf32> to vector<1x1xf32>
    %24 = vector.broadcast %23 : vector<1x1xf32> to vector<8x128xf32>
    %c0_7 = arith.constant 0 : index
    %c0_8 = arith.constant 0 : index
    %25 = vector.load %arg3[%c0_7, %c0_8] : memref<8x128xf32, #tpu.memory_space<vmem>>, vector<8x128xf32>
    tpu.vector_store %arg3[%c0_7, %c0_8], %24 {strides = array<i32>} : memref<8x128xf32, #tpu.memory_space<vmem>>, vector<8x128xf32>,
    return
  }
  func.func @transform_0(%arg0: i32) -> (i32, i32) {
    %c0_i32 = arith.constant 0 : i32
    %c0_i32_0 = arith.constant 0 : i32
    %c0_i32_1 = arith.constant 0 : i32
    return %c0_i32, %c0_i32_0 : i32, i32
  }
  func.func @transform_1(%arg0: i32) -> (i32, i32) {
    %c0_i32 = arith.constant 0 : i32
    %c0_i32_0 = arith.constant 0 : i32
    return %arg0, %c0_i32 : i32, i32
  }
  func.func @transform_2(%arg0: i32) -> (i32, i32) {
    %c0_i32 = arith.constant 0 : i32
    %c0_i32_0 = arith.constant 0 : i32
    return %arg0, %c0_i32 : i32, i32
  }
}

</mosaic_0001>

<bundles_post_ra>
// kernel: tpu_custom_call.1
= control target key start
LH: loop header
LB: loop body
LE: loop exit
PB: predicated region body
PF: predicated region fallthrough
CT: control target
= control target key end

     0   :  { %7 = vsyncpa [#allocation3], 0  ;;  %s184_s0 = inlined_call_operand.hbm [shape: f32[1,128], index: 0, kind: input, shape index: {}]   ;;  %s185_s1 = inlined_call_operand.hbm [shape: f32[8,128], index: 1, kind: input, shape index: {}]   ;;  %s186_s2 = inlined_call_operand.hbm [shape: f32[8,128], index: 2, kind: output, shape index: {}]  }
   0x1   :  { %8 = vsyncpa [#allocation6], 0 }
   0x2   :  { %9 = vsyncpa [#allocation4], 0  ;;  %s157_s9 = smov [#allocation2]   ;;  %s158_s11 = smov [#allocation5]  }
   0x3   :  { %s16_s10 = sshll.u32 %s157_s9, 4  ;;  %s26_s12 = sshll.u32 %s158_s11, 4  ;;  %s17_s10 = int_to_ptr.vmem [resolvable:$true] %s16_s10  ;;  %s27_s12 = int_to_ptr.vmem [resolvable:$true] %s26_s12 }
   0x4   :  { %s99_s13 = scalar_lea.vmem %s17_s10, 16  ;;  %s103_s14 = scalar_lea.vmem %s17_s10, 32 }
   0x5   :  { %p100_p0 = scmp.ne.s32.totalorder %s17_s10, %s99_s13  ;;  %p104_p1 = scmp.lt.s32.totalorder %s17_s10, %s17_s10 }
   0x6   :  { %p105_p2 = scmp.lt.s32.totalorder %s103_s14, %s99_s13 }
   0x8   :  { %p106_p3 = por %p105_p2, %p104_p1 }
   0xa   :  { %p107_p4 = pnand %p106_p3, %p100_p0 }
   0xc   :  { %110 = shalt.err (!%p107_p4)
}
   0xd   :  { %19 = dma.hbm_to_vmem [thread:$0]  %s184_s0, 16, %s17_s10, [#allocation3]  }
   0xe   :  { %s119_s17 = scalar_lea.vmem %s27_s12, 128  ;;  %p124_p6 = scmp.lt.s32.totalorder %s27_s12, %s27_s12 }
   0xf   :  { %p120_p5 = scmp.ne.s32.totalorder %s27_s12, %s119_s17  ;;  %p125_p7 = scmp.lt.s32.totalorder %s119_s17, %s119_s17 }
  0x11   :  { %p126_p8 = por %p125_p7, %p124_p6 }
  0x13   :  { %p127_p9 = pnand %p126_p8, %p120_p5 }
  0x15   :  { %130 = shalt.err (!%p127_p9)
}
  0x16   :  { %29 = dma.hbm_to_vmem [thread:$0]  %s185_s1, 128, %s27_s12, [#allocation6]  }
  0x17   :  { %151 = dma.done.wait [#allocation3], 16  }
  0x18   :  { %152 = vsyncadd [#allocation3], 4294967280 }
  0x19   :  { %153 = dma.done.wait [#allocation6], 128  }
  0x1a   :  { %154 = vsyncadd [#allocation6], 4294967168  ;;  %v36_v0 = vld [vmem:[#allocation5] sm:$0xff]  ;;  %v85_v1 = vld [vmem:[#allocation2] ss:$0 sm:$0xff]  ;;  %v50_v3 = vlaneseq  ;;  %vm56_vm1 = vcmask 7168  }
  0x1b   :  { %v44_v2 = vmul.f32 %v85_v1, %v36_v0  ;;  %s159_s0 = smov [#allocation7]  }
  0x1c   :  { %v51_v4 = vshrl.u32 %v50_v3, 7  ;;  %s75_s1 = sshll.u32 %s159_s0, 4  ;;  %s76_s1 = int_to_ptr.vmem [resolvable:$true] %s75_s1 }
  0x1d   :  { %45 = vadd.xlane.f32.xlu0 %v44_v2  ;;  %s131_s21 = scalar_lea.vmem %s76_s1, 128  ;;  %p136_p11 = scmp.lt.s32.totalorder %s76_s1, %s76_s1 }
  0x1e   :  { %vm54_vm0 = vcmp.lt.s32.totalorder %v51_v4, 3  ;;  %p132_p10 = scmp.ne.s32.totalorder %s76_s1, %s131_s21  ;;  %p137_p12 = scmp.lt.s32.totalorder %s131_s21, %s131_s21 }
  0x20   :  { %p138_p13 = por %p137_p12, %p136_p11 }
  0x22   :  { %p139_p0 = pnand %p138_p13, %p132_p10 }
  0xa6   :  { %v46_v5 = vpop.xlane.xlu0 %45 }
  0xa7   :  { %v47_v6 = vadd.f32 1.0, %v46_v5 }
  0xa9   :  { %v48_v7 = vmax.f32 %v47_v6, 0.0 }
  0xab   :  { %v55_v8 = vsel %vm54_vm0, %v48_v7, 0.0 }
  0xac   :  { %v57_v9 = vsel %vm56_vm1, %v55_v8, 0.0 }
  0xad   :  { %58 = vadd.xlane.f32.xlu0 %v57_v9 }
 0x136   :  { %v59_v10 = vpop.xlane.xlu0 %58 }
 0x137   :  { %v60_v11 = vrot.slane %v59_v10, 4 }
 0x139   :  { %v61_v12 = vadd.f32 %v60_v11, %v59_v10 }
 0x13b   :  { %v62_v13 = vrot.slane %v61_v12, 2 }
 0x13d   :  { %v63_v14 = vadd.f32 %v62_v13, %v61_v12 }
 0x13f   :  { %v64_v15 = vrot.slane %v63_v14, 1 }
 0x141   :  { %v65_v16 = vadd.f32 %v64_v15, %v63_v14 }
 0x143   :  { %86 = vpush %v65_v16 }
 0x174   :  { %s87_s20 = spop %86 }
 0x175   :  { %v67_v17 = vstv %s87_s20 }
 0x176   :  { %68 = vst [vmem:[#allocation7] sm:$0xff] %v67_v17 }
 0x177   :  { %142 = shalt.err (!%p139_p0)
}
 0x178   :  { %78 = dma.vmem_to_hbm [thread:$0]  %s76_s1, 128, %s186_s2, [#allocation4]  }
 0x179   :  { %155 = dma.done.wait [#allocation4], 128  }
 0x17a   :  { %156 = vsyncadd [#allocation4], 4294967168 }
 0x17b   :  { %82 = vsyncpa [#allocation3], 1 }
 0x17c   :  { %83 = vsyncpa [#allocation6], 1 }
 0x17d   :  { %84 = vsyncpa [#allocation4], 1 }

</bundles_post_ra>
